<compile_context>
chip_gen: v5e
topology: v5e:2x2
jax: 0.10.0
libtpu: 0.0.40
codegen_flags: <defaults>
</compile_context>

<pallas_src>
import math

import jax
import jax.numpy as jnp
from jax.experimental import pallas as pl
from jax.experimental.pallas import tpu as pltpu

_TARGET_BLOCK_BYTES = 4 * 1024 * 1024   # x-tile byte target (HBM-roofline plateau)


def _round_down(x, m):
    return (x // m) * m


def _round_up(x, m):
    return ((x + m - 1) // m) * m


def _vmem_capacity_bytes():
    try:
        return int(pltpu.get_tpu_info().vmem_capacity_bytes)
    except Exception:
        return 64 * 1024 * 1024   # conservative fallback (v7x per-TC VMEM)


def lora_kernel(x_ref, a_ref, b_ref, o_ref):
    # Two chained MXU matmuls (native-dtype inputs, f32 accumulate) + residual.
    x = x_ref[...]
    xa = jnp.dot(x, a_ref[...], preferred_element_type=jnp.float32)
    xab = jnp.dot(xa.astype(b_ref.dtype), b_ref[...],
                  preferred_element_type=jnp.float32)
    o_ref[...] = (x.astype(jnp.float32) + xab).astype(o_ref.dtype)


def _choose_tm(batch, dp, rank, itemsize, vmem_budget):
    sub = max(8, 32 // itemsize)            # sublane packing: 8 (f32), 16 (bf16)
    if batch <= sub:
        return batch                        # block == full batch dim (legal)

    row_bytes = dp * itemsize
    # Bytes-based target for the x tile.
    tm_target = max(sub, _round_down(_TARGET_BLOCK_BYTES // max(row_bytes, 1), sub))
    # VMEM fit: double-buffered x + out tiles, f32 xa/xab intermediates,
    # A/B double-buffered.
    per_row = 4 * dp * itemsize + (rank + dp) * 4
    fixed = 2 * (2 * dp * rank) * itemsize
    tm_fit = max(sub, _round_down(max(vmem_budget - fixed, 0) // max(per_row, 1), sub))
    # Megacore balance: at least 2 grid steps over the batch axis.
    tm_cap = max(sub, _round_up(-(-batch // 2), sub))
    # Don't exceed the batch (keeps the block within the array; last block
    # may still be partial and is masked by Pallas).
    tm_max = max(sub, _round_down(batch, sub))
    return max(sub, min(tm_target, tm_fit, tm_cap, tm_max))


def lora_forward(x, A, B):
    batch, in_dim = x.shape
    in_dim_a, rank = A.shape
    rank_b, out_dim = B.shape
    assert in_dim_a == in_dim and rank_b == rank
    assert out_dim == in_dim, "residual add requires output_dim == input_dim"

    itemsize = jnp.dtype(x.dtype).itemsize
    dp = in_dim                             # full feature dim as lane block dim

    vmem_cap = _vmem_capacity_bytes()
    vmem_budget = int(0.75 * vmem_cap)
    tm = _choose_tm(batch, dp, rank, itemsize, vmem_budget)

    grid = (pl.cdiv(batch, tm),)

    # VMEM estimate / limit (leave headroom below physical capacity).
    per_row = 4 * dp * itemsize + (rank + dp) * 4
    fixed = 2 * (2 * dp * rank) * itemsize
    vmem_est = per_row * tm + fixed
    vmem_limit = int(min(max(int(1.3 * vmem_est), 32 * 1024 * 1024),
                         int(0.85 * vmem_cap)))

    flops = 2 * batch * dp * rank + 2 * batch * rank * dp + batch * dp
    bytes_accessed = (2 * batch * dp + 2 * dp * rank) * itemsize

    out = pl.pallas_call(
        lora_kernel,
        out_shape=jax.ShapeDtypeStruct((batch, out_dim), x.dtype),
        grid_spec=pltpu.PrefetchScalarGridSpec(
            num_scalar_prefetch=0,
            grid=grid,
            in_specs=[
                pl.BlockSpec((tm, dp), lambda i: (i, 0)),     # x tile (pipelined)
                pl.BlockSpec((dp, rank), lambda i: (0, 0)),   # A resident
                pl.BlockSpec((rank, dp), lambda i: (0, 0)),   # B resident
            ],
            out_specs=pl.BlockSpec((tm, dp), lambda i: (i, 0)),
        ),
        compiler_params=pltpu.CompilerParams(
            dimension_semantics=("parallel",),
            vmem_limit_bytes=vmem_limit,
        ),
        cost_estimate=pl.CostEstimate(
            flops=int(flops), transcendentals=0,
            bytes_accessed=int(bytes_accessed)),
    )(x, A, B)
    return out


def init_lora_params(key, input_dim, output_dim, rank, dtype=jnp.float32):
    # Reproduce reset_parameters():
    #   nn.init.kaiming_uniform_(A, a=sqrt(5)):
    #     fan_in = A.shape[1] = rank, gain = sqrt(2/(1+a^2)),
    #     bound = gain*sqrt(3/fan_in)
    #   nn.init.zeros_(B)
    a = math.sqrt(5.0)
    gain = math.sqrt(2.0 / (1.0 + a * a))
    bound = gain * math.sqrt(3.0 / rank)
    A = jax.random.uniform(key, (input_dim, rank), dtype=dtype,
                           minval=-bound, maxval=bound)
    B = jnp.zeros((rank, output_dim), dtype=dtype)
    return A, B


if __name__ == "__main__":
    key = jax.random.PRNGKey(0)
    kx, kA, kB, kx2, kA2 = jax.random.split(key, 5)

    # --- Test 1: module-sized toy shapes, init exactly as reset_parameters() ---
    batch, input_dim, output_dim, rank = 8, 32, 32, 4
    x = jax.random.normal(kx, (batch, input_dim), dtype=jnp.float32)
    A, B = init_lora_params(kA, input_dim, output_dim, rank)
    out = jax.block_until_ready(lora_forward(x, A, B))
    ref = x + x @ A @ B
    assert out.shape == (batch, output_dim)
    assert jnp.allclose(out, ref, atol=1e-5, rtol=1e-5)

    # --- Test 2: non-zero B, non-divisible batch -> exercises partial-block
    # masking (no host padding/slicing) and multi-step pipelined grid ---
    batch2, dim2, rank2 = 300, 256, 8
    x2 = jax.random.normal(kx2, (batch2, dim2), dtype=jnp.float32)
    A2 = jax.random.normal(kA2, (dim2, rank2), dtype=jnp.float32) * 0.05
    B2 = jax.random.normal(kB, (rank2, dim2), dtype=jnp.float32) * 0.05
    out2 = jax.block_until_ready(lora_forward(x2, A2, B2))
    ref2 = x2 + x2 @ A2 @ B2
    assert out2.shape == (batch2, dim2)
    assert jnp.allclose(out2, ref2, atol=1e-4, rtol=1e-4)

    print("KERNEL_OK")
</pallas_src>

<mosaic_0001>
module attributes {stable_mosaic.version = 11 : i64} {
  func.func @lora_kernel(%arg0: i32, %arg1: memref<8x32xf32, #tpu.memory_space<vmem>>, %arg2: memref<32x4xf32, #tpu.memory_space<vmem>>, %arg3: memref<4x32xf32, #tpu.memory_space<vmem>>, %arg4: memref<8x32xf32, #tpu.memory_space<vmem>>) attributes {dimension_semantics = [#tpu.dimension_semantics<parallel>], iteration_bounds = array<i64: 1>, scalar_prefetch = 0 : i64, scratch_operands = 0 : i64, tpu.core_type = #tpu.core_type<tc>, window_params = [{transform_indices = @transform_0, window_bounds = array<i64: 8, 32>}, {pipeline_mode = #tpu.pipeline_mode<synchronous>, transform_indices = @transform_1, window_bounds = array<i64: 32, 4>}, {pipeline_mode = #tpu.pipeline_mode<synchronous>, transform_indices = @transform_2, window_bounds = array<i64: 4, 32>}, {transform_indices = @transform_3, window_bounds = array<i64: 8, 32>}]} {
    %c0 = arith.constant 0 : index
    %c0_0 = arith.constant 0 : index
    %0 = vector.load %arg1[%c0, %c0_0] : memref<8x32xf32, #tpu.memory_space<vmem>>, vector<8x32xf32>
    %c0_1 = arith.constant 0 : index
    %c0_2 = arith.constant 0 : index
    %1 = vector.load %arg2[%c0_1, %c0_2] : memref<32x4xf32, #tpu.memory_space<vmem>>, vector<32x4xf32>
    %cst = arith.constant dense<0.000000e+00> : vector<8x4xf32>
    %2 = tpu.matmul %0, %1, %cst {dimension_numbers = #tpu.dot_dimension_numbers<[1], [0], [0], [1], [0, 0, 1, 1], [], []>} : vector<8x32xf32>, vector<32x4xf32>, vector<8x4xf32> -> vector<8x4xf32>
    %c0_3 = arith.constant 0 : index
    %c0_4 = arith.constant 0 : index
    %3 = vector.load %arg3[%c0_3, %c0_4] : memref<4x32xf32, #tpu.memory_space<vmem>>, vector<4x32xf32>
    %cst_5 = arith.constant dense<0.000000e+00> : vector<8x32xf32>
    %4 = tpu.matmul %2, %3, %cst_5 {dimension_numbers = #tpu.dot_dimension_numbers<[1], [0], [0], [1], [0, 0, 1, 1], [], []>} : vector<8x4xf32>, vector<4x32xf32>, vector<8x32xf32> -> vector<8x32xf32>
    %5 = arith.addf %0, %4 : vector<8x32xf32>
    %c0_6 = arith.constant 0 : index
    %c0_7 = arith.constant 0 : index
    %6 = vector.load %arg4[%c0_6, %c0_7] : memref<8x32xf32, #tpu.memory_space<vmem>>, vector<8x32xf32>
    tpu.vector_store %arg4[%c0_6, %c0_7], %5 {strides = array<i32>} : memref<8x32xf32, #tpu.memory_space<vmem>>, vector<8x32xf32>,
    return
  }
  func.func @transform_0(%arg0: i32) -> (i32, i32) {
    %c0_i32 = arith.constant 0 : i32
    %c0_i32_0 = arith.constant 0 : i32
    return %arg0, %c0_i32 : i32, i32
  }
  func.func @transform_1(%arg0: i32) -> (i32, i32) {
    %c0_i32 = arith.constant 0 : i32
    %c0_i32_0 = arith.constant 0 : i32
    %c0_i32_1 = arith.constant 0 : i32
    return %c0_i32, %c0_i32_0 : i32, i32
  }
  func.func @transform_2(%arg0: i32) -> (i32, i32) {
    %c0_i32 = arith.constant 0 : i32
    %c0_i32_0 = arith.constant 0 : i32
    %c0_i32_1 = arith.constant 0 : i32
    return %c0_i32, %c0_i32_0 : i32, i32
  }
  func.func @transform_3(%arg0: i32) -> (i32, i32) {
    %c0_i32 = arith.constant 0 : i32
    %c0_i32_0 = arith.constant 0 : i32
    return %arg0, %c0_i32 : i32, i32
  }
}

</mosaic_0001>

<bundles_post_ra>
// kernel: tpu_custom_call.1
= control target key start
LH: loop header
LB: loop body
LE: loop exit
PB: predicated region body
PF: predicated region fallthrough
CT: control target
= control target key end

     0   :  { %s165_s0 = inlined_call_operand.vmem [shape: f32[8,32], index: 0, kind: input, shape index: {}]   ;;  %s166_s1 = inlined_call_operand.vmem [shape: f32[32,4], index: 1, kind: input, shape index: {}]   ;;  %s167_s2 = inlined_call_operand.vmem [shape: f32[4,32], index: 2, kind: input, shape index: {}]   ;;  %s168_s3 = inlined_call_operand.hbm [shape: f32[8,32], index: 3, kind: output, shape index: {}]  }
   0x1   :  { %v19_v0 = vld [vmem:[%s166_s1 + $0x18] sm:$0xff]  ;;  %v18_v1 = vld [vmem:[%s166_s1 + $0x10] sm:$0xff] }
   0x2   :  { %36 = vmatpush.msra.mxu0 %v19_v0 }
   0x3   :  { %8 = vsyncpa [#allocation3], 0  ;;  %v17_v2 = vld [vmem:[%s166_s1 + $0x8] sm:$0xff]  ;;  %v16_v3 = vld [vmem:[%s166_s1] sm:$0xff]  ;;  %vm20_vm0 = vcmask 261120   ;;  %vm49_vm1 = vcmask 1043456  }
   0x4   :  { %37 = vmatpush.msra.mxu0 %v18_v1  ;;  %v15_v4 = vld [vmem:[%s165_s0] sm:$0xff]  ;;  %vm45_vm2 = vcmask 31744   ;;  %s121_s24 = smov [#allocation2]   ;;  %s82_s27 = sshll.u32 %s168_s3, 4  ;;  %s83_s27 = int_to_ptr.hbm [resolvable:$true] %s82_s27 }
   0x5   :  { %v44_v5 = vld [vmem:[%s167_s2] sm:$0xf]  ;;  %s80_s1 = sshll.u32 %s121_s24, 4  ;;  %s81_s1 = int_to_ptr.vmem [resolvable:$true] %s80_s1 }
   0x6   :  { %38 = vmatpush.msra.mxu0 %v17_v2  ;;  %92 = vmatpush.msk.msra.mxu1 %vm49_vm1, %v44_v5 }
   0x8   :  { %39 = vmatpush.msra.mxu0 %v16_v3 }
   0x9   :  { %91 = vmatmul.msk.f32.vlgmr.msra.gmra.mxu0 %vm20_vm0, %v15_v4 }
  0x86   :  { %v41_v6 = vpop.f32.mrf.mxu0 }
  0x87   :  { %93 = vmatmul.msk.f32.vlgmr.msra.gmra.mxu1 %vm45_vm2, %v41_v6 }
 0x104   :  { %v70_v7 = vpop.f32.mrf.mxu1 }
 0x105   :  { %v73_v8 = vadd.f32 %v70_v7, %v15_v4 }
 0x107   :  { %74 = vst.msk [vmem:[#allocation2] sm:$0xff] %vm20_vm0, %v73_v8 }
 0x108   :  { %85 = dma.vmem_to_hbm [thread:$0]  %s81_s1, 128, %s83_s27, [#allocation3]  }
 0x109   :  { %119 = dma.done.wait [#allocation3], 128  }
 0x10a   :  { %120 = vsyncadd [#allocation3], 4294967168 }
 0x10b   :  { %90 = vsyncpa [#allocation3], 1 }

</bundles_post_ra>
